<compile_context>
chip_gen: v7x
topology: tpu7x:2x2x1
jax: 0.10.0
libtpu: 0.0.40
codegen_flags: <defaults>
</compile_context>

<pallas_src>
import functools

import jax
import jax.numpy as jnp
from jax.experimental import pallas as pl
from jax.experimental.pallas import tpu as pltpu

# Cody-Waite split of pi/2 (f32 range reduction) + Cephes minimax coefficients
# for sin/cos on |r| <= pi/4.
_TWO_OVER_PI = 0.6366197723675814
_PIO2_A = 1.5703125                      # short mantissa: q * _PIO2_A is exact
_PIO2_B = 4.837512969970703125e-4
_PIO2_C = 7.549789948768648e-8
_S1, _S2, _S3 = -1.6666654611e-1, 8.3321608736e-3, -1.9515295891e-4
_C1, _C2, _C3 = 4.166664568298827e-2, -1.388731625493765e-3, 2.443315711809948e-5


def _round_up(x, k):
    return (x + k - 1) // k * k


def _fused_sincos(x):
    """sin(x), cos(x) with one shared range reduction (pure VPU, no lane moves)."""
    j = jnp.floor(x * _TWO_OVER_PI + 0.5)               # nearest int of x / (pi/2)
    r = ((x - j * _PIO2_A) - j * _PIO2_B) - j * _PIO2_C  # |r| <= pi/4
    q = j.astype(jnp.int32) & 3                           # quadrant in [0, 3]
    r2 = r * r
    sin_r = ((_S3 * r2 + _S2) * r2 + _S1) * r2 * r + r
    cos_r = ((_C3 * r2 + _C2) * r2 + _C1) * (r2 * r2) - 0.5 * r2 + 1.0
    swap = (q & 1) == 1
    s_sel = jnp.where(swap, cos_r, sin_r)
    c_sel = jnp.where(swap, sin_r, cos_r)
    sin_x = jnp.where((q & 2) == 2, -s_sel, s_sel)
    cos_x = jnp.where(((q + 1) & 2) == 2, -c_sel, c_sel)
    return sin_x, cos_x


def _pos_enc_kernel(dist_ref, invfreq_ref, out_ref, *, half):
    # dist_ref:    (TILE_M, 1)       f32
    # invfreq_ref: (1, half)         f32   (resident: constant block index)
    # out_ref:     (TILE_M, 2*half)  out dtype
    x = dist_ref[...] * invfreq_ref[...]                 # (TILE_M, half) broadcast mul
    sin_x, cos_x = _fused_sincos(x)
    # Two direct slice stores — no lane-dim concatenate / extra VMEM copy.
    out_ref[:, :half] = sin_x.astype(out_ref.dtype)
    out_ref[:, half:] = cos_x.astype(out_ref.dtype)


def _pick_tile_m(m, d_model, vmem_budget_bytes=8 << 20):
    """Rows per grid step from a VMEM byte budget.

    Per step (double-buffered): output block = rows*d_model*4 B and the
    (rows, 1) dist block lane-pads to 128 lanes -> rows*128*4 B.
    """
    per_row_bytes = 2 * 4 * (d_model + 128)
    rows = max(8, (vmem_budget_bytes // per_row_bytes) // 8 * 8)
    if rows >= m:
        # Whole M fits one block.  If M is large, still split in two so the
        # "parallel" grid axis feeds both TensorCores on v7x; negligible cost
        # on single-TC v5e/v6e.
        if m >= 2048:
            return _round_up((m + 1) // 2, 8)
        return m
    return rows


def transformer_positional_encoding(
    distance_bins,
    d_model,
    pos_emb_base_pow=10000,
    tile_m=None,
    out_dtype=jnp.float32,   # optionally jnp.bfloat16 on v6e/v7x if downstream allows
):
    """Pallas TPU implementation of TransformerPositionalEncoding.forward."""
    assert d_model % 2 == 0, "d_model must be even"
    batch_size, num_bins = distance_bins.shape
    m = batch_size * num_bins
    half = d_model // 2

    # Parameter-free module: inv_freq derived deterministically (matches torch).
    freq_seq = jnp.arange(0, d_model, 2.0, dtype=jnp.float32)              # (half,)
    inv_freq = 1.0 / jnp.power(
        jnp.float32(pos_emb_base_pow), freq_seq / jnp.float32(d_model)
    )
    inv_freq_2d = inv_freq.reshape(1, half)                                # (1, half)

    dists_flat = distance_bins.reshape(m, 1).astype(jnp.float32)           # (M, 1)

    if tile_m is None:
        tile_m = _pick_tile_m(m, d_model)
    tile_m = min(tile_m, m)
    if tile_m < m:
        tile_m = max(8, (tile_m // 8) * 8)   # sublane multiple when actually tiling

    grid = (pl.cdiv(m, tile_m),)             # ragged last block handled by Pallas

    out = pl.pallas_call(
        functools.partial(_pos_enc_kernel, half=half),
        out_shape=jax.ShapeDtypeStruct((m, d_model), out_dtype),
        grid=grid,
        in_specs=[
            pl.BlockSpec((tile_m, 1), lambda i: (i, 0)),
            pl.BlockSpec((1, half), lambda i: (0, 0)),    # resident, no re-DMA
        ],
        out_specs=pl.BlockSpec((tile_m, d_model), lambda i: (i, 0)),
        compiler_params=pltpu.CompilerParams(
            dimension_semantics=("parallel",),            # shard M across TCs on v7x
        ),
        cost_estimate=pl.CostEstimate(
            flops=30 * m * half,                          # fused sincos VPU work
            transcendentals=0,
            bytes_accessed=4 * m + 4 * half + m * d_model * jnp.dtype(out_dtype).itemsize,
        ),
    )(dists_flat, inv_freq_2d)

    return out.reshape(batch_size, num_bins, d_model)


def _reference(distance_bins, d_model, pos_emb_base_pow=10000):
    freq_seq = jnp.arange(0, d_model, 2.0, dtype=jnp.float32)
    inv_freq = 1.0 / jnp.power(
        jnp.float32(pos_emb_base_pow), freq_seq / jnp.float32(d_model)
    )
    b, n = distance_bins.shape
    dists_flat = distance_bins.reshape(-1).astype(jnp.float32)
    sinusoid_inp = jnp.einsum("i,d->id", dists_flat, inv_freq)
    pos_emb = jnp.concatenate([jnp.sin(sinusoid_inp), jnp.cos(sinusoid_inp)], axis=-1)
    return pos_emb.reshape(b, n, d_model)


if __name__ == "__main__":
    key = jax.random.PRNGKey(0)
    batch_size, num_bins, d_model = 2, 8, 32

    # Distance bins: arbitrary (possibly negative) binned distances.
    distance_bins = jax.random.uniform(
        key, (batch_size, num_bins), dtype=jnp.float32, minval=-50.0, maxval=50.0
    )

    pos_emb = transformer_positional_encoding(distance_bins, d_model)
    pos_emb = jax.block_until_ready(pos_emb)

    ref = _reference(distance_bins, d_model)
    assert pos_emb.shape == (batch_size, num_bins, d_model)
    assert jnp.allclose(pos_emb, ref, atol=1e-5, rtol=1e-5), float(
        jnp.max(jnp.abs(pos_emb - ref))
    )

    # Also exercise the multi-step grid with a ragged last block (m % tile_m != 0).
    db2 = jax.random.uniform(
        jax.random.PRNGKey(1), (2, 9), dtype=jnp.float32, minval=0.0, maxval=50.0
    )
    pe2 = jax.block_until_ready(
        transformer_positional_encoding(db2, d_model, tile_m=8)
    )
    assert jnp.allclose(pe2, _reference(db2, d_model), atol=1e-5, rtol=1e-5)

    print("KERNEL_OK")
</pallas_src>

<mosaic_0001>
module attributes {stable_mosaic.version = 11 : i64} {
  func.func @_pos_enc_kernel(%arg0: i32, %arg1: memref<16x1xf32, #tpu.memory_space<vmem>>, %arg2: memref<1x16xf32, #tpu.memory_space<vmem>>, %arg3: memref<16x32xf32, #tpu.memory_space<vmem>>) attributes {dimension_semantics = [#tpu.dimension_semantics<parallel>], iteration_bounds = array<i64: 1>, scalar_prefetch = 0 : i64, scratch_operands = 0 : i64, tpu.core_type = #tpu.core_type<tc>, window_params = [{transform_indices = @transform_0, window_bounds = array<i64: 16, 1>}, {pipeline_mode = #tpu.pipeline_mode<synchronous>, transform_indices = @transform_1, window_bounds = array<i64: 1, 16>}, {transform_indices = @transform_2, window_bounds = array<i64: 16, 32>}]} {
    %c0 = arith.constant 0 : index
    %c0_0 = arith.constant 0 : index
    %0 = vector.load %arg1[%c0, %c0_0] : memref<16x1xf32, #tpu.memory_space<vmem>>, vector<16x1xf32>
    %c0_1 = arith.constant 0 : index
    %c0_2 = arith.constant 0 : index
    %1 = vector.load %arg2[%c0_1, %c0_2] : memref<1x16xf32, #tpu.memory_space<vmem>>, vector<1x16xf32>
    %2 = vector.broadcast %0 : vector<16x1xf32> to vector<16x16xf32>
    %3 = vector.broadcast %1 : vector<1x16xf32> to vector<16x16xf32>
    %4 = arith.mulf %2, %3 : vector<16x16xf32>
    %cst = arith.constant 0.636619746 : f32
    %5 = vector.broadcast %cst : f32 to vector<16x16xf32>
    %6 = arith.mulf %4, %5 : vector<16x16xf32>
    %cst_3 = arith.constant 5.000000e-01 : f32
    %7 = vector.broadcast %cst_3 : f32 to vector<16x16xf32>
    %8 = arith.addf %6, %7 : vector<16x16xf32>
    %9 = math.floor %8 : vector<16x16xf32>
    %cst_4 = arith.constant 1.5703125 : f32
    %10 = vector.broadcast %cst_4 : f32 to vector<16x16xf32>
    %11 = arith.mulf %9, %10 : vector<16x16xf32>
    %12 = arith.subf %4, %11 : vector<16x16xf32>
    %cst_5 = arith.constant 4.83751297E-4 : f32
    %13 = vector.broadcast %cst_5 : f32 to vector<16x16xf32>
    %14 = arith.mulf %9, %13 : vector<16x16xf32>
    %15 = arith.subf %12, %14 : vector<16x16xf32>
    %cst_6 = arith.constant 7.549790e-08 : f32
    %16 = vector.broadcast %cst_6 : f32 to vector<16x16xf32>
    %17 = arith.mulf %9, %16 : vector<16x16xf32>
    %18 = arith.subf %15, %17 : vector<16x16xf32>
    %19 = arith.fptosi %9 : vector<16x16xf32> to vector<16x16xi32>
    %c3_i32 = arith.constant 3 : i32
    %20 = vector.broadcast %c3_i32 : i32 to vector<16x16xi32>
    %21 = arith.andi %19, %20 : vector<16x16xi32>
    %22 = arith.mulf %18, %18 : vector<16x16xf32>
    %cst_7 = arith.constant -1.95152956E-4 : f32
    %23 = vector.broadcast %cst_7 : f32 to vector<16x16xf32>
    %24 = arith.mulf %23, %22 : vector<16x16xf32>
    %cst_8 = arith.constant 0.00833216123 : f32
    %25 = vector.broadcast %cst_8 : f32 to vector<16x16xf32>
    %26 = arith.addf %24, %25 : vector<16x16xf32>
    %27 = arith.mulf %26, %22 : vector<16x16xf32>
    %cst_9 = arith.constant -0.166666552 : f32
    %28 = vector.broadcast %cst_9 : f32 to vector<16x16xf32>
    %29 = arith.addf %27, %28 : vector<16x16xf32>
    %30 = arith.mulf %29, %22 : vector<16x16xf32>
    %31 = arith.mulf %30, %18 : vector<16x16xf32>
    %32 = arith.addf %31, %18 : vector<16x16xf32>
    %cst_10 = arith.constant 2.44331568E-5 : f32
    %33 = vector.broadcast %cst_10 : f32 to vector<16x16xf32>
    %34 = arith.mulf %33, %22 : vector<16x16xf32>
    %cst_11 = arith.constant -0.00138873165 : f32
    %35 = vector.broadcast %cst_11 : f32 to vector<16x16xf32>
    %36 = arith.addf %34, %35 : vector<16x16xf32>
    %37 = arith.mulf %36, %22 : vector<16x16xf32>
    %cst_12 = arith.constant 0.0416666456 : f32
    %38 = vector.broadcast %cst_12 : f32 to vector<16x16xf32>
    %39 = arith.addf %37, %38 : vector<16x16xf32>
    %40 = arith.mulf %22, %22 : vector<16x16xf32>
    %41 = arith.mulf %39, %40 : vector<16x16xf32>
    %cst_13 = arith.constant 5.000000e-01 : f32
    %42 = vector.broadcast %cst_13 : f32 to vector<16x16xf32>
    %43 = arith.mulf %42, %22 : vector<16x16xf32>
    %44 = arith.subf %41, %43 : vector<16x16xf32>
    %cst_14 = arith.constant 1.000000e+00 : f32
    %45 = vector.broadcast %cst_14 : f32 to vector<16x16xf32>
    %46 = arith.addf %44, %45 : vector<16x16xf32>
    %c1_i32 = arith.constant 1 : i32
    %47 = vector.broadcast %c1_i32 : i32 to vector<16x16xi32>
    %48 = arith.andi %21, %47 : vector<16x16xi32>
    %c1_i32_15 = arith.constant 1 : i32
    %49 = vector.broadcast %c1_i32_15 : i32 to vector<16x16xi32>
    %50 = arith.cmpi eq, %48, %49 : vector<16x16xi32>
    %51 = arith.select %50, %46, %32 : vector<16x16xi1>, vector<16x16xf32>
    %52 = arith.select %50, %32, %46 : vector<16x16xi1>, vector<16x16xf32>
    %c2_i32 = arith.constant 2 : i32
    %53 = vector.broadcast %c2_i32 : i32 to vector<16x16xi32>
    %54 = arith.andi %21, %53 : vector<16x16xi32>
    %c2_i32_16 = arith.constant 2 : i32
    %55 = vector.broadcast %c2_i32_16 : i32 to vector<16x16xi32>
    %56 = arith.cmpi eq, %54, %55 : vector<16x16xi32>
    %cst_17 = arith.constant 0.000000e+00 : f32
    %57 = vector.broadcast %cst_17 : f32 to vector<16x16xf32>
    %58 = arith.subf %57, %51 : vector<16x16xf32>
    %59 = arith.select %56, %58, %51 : vector<16x16xi1>, vector<16x16xf32>
    %c1_i32_18 = arith.constant 1 : i32
    %60 = vector.broadcast %c1_i32_18 : i32 to vector<16x16xi32>
    %61 = arith.addi %21, %60 : vector<16x16xi32>
    %c2_i32_19 = arith.constant 2 : i32
    %62 = vector.broadcast %c2_i32_19 : i32 to vector<16x16xi32>
    %63 = arith.andi %61, %62 : vector<16x16xi32>
    %c2_i32_20 = arith.constant 2 : i32
    %64 = vector.broadcast %c2_i32_20 : i32 to vector<16x16xi32>
    %65 = arith.cmpi eq, %63, %64 : vector<16x16xi32>
    %cst_21 = arith.constant 0.000000e+00 : f32
    %66 = vector.broadcast %cst_21 : f32 to vector<16x16xf32>
    %67 = arith.subf %66, %52 : vector<16x16xf32>
    %68 = arith.select %65, %67, %52 : vector<16x16xi1>, vector<16x16xf32>
    %c0_22 = arith.constant 0 : index
    %c0_23 = arith.constant 0 : index
    %69 = vector.load %arg3[%c0_22, %c0_23] : memref<16x32xf32, #tpu.memory_space<vmem>>, vector<16x16xf32>
    tpu.vector_store %arg3[%c0_22, %c0_23], %59 {strides = array<i32>} : memref<16x32xf32, #tpu.memory_space<vmem>>, vector<16x16xf32>,
    %c0_24 = arith.constant 0 : index
    %c16 = arith.constant 16 : index
    %70 = vector.load %arg3[%c0_24, %c16] : memref<16x32xf32, #tpu.memory_space<vmem>>, vector<16x16xf32>
    tpu.vector_store %arg3[%c0_24, %c16], %68 {strides = array<i32>} : memref<16x32xf32, #tpu.memory_space<vmem>>, vector<16x16xf32>,
    return
  }
  func.func @transform_0(%arg0: i32) -> (i32, i32) {
    %c0_i32 = arith.constant 0 : i32
    %c0_i32_0 = arith.constant 0 : i32
    return %arg0, %c0_i32 : i32, i32
  }
  func.func @transform_1(%arg0: i32) -> (i32, i32) {
    %c0_i32 = arith.constant 0 : i32
    %c0_i32_0 = arith.constant 0 : i32
    %c0_i32_1 = arith.constant 0 : i32
    return %c0_i32, %c0_i32_0 : i32, i32
  }
  func.func @transform_2(%arg0: i32) -> (i32, i32) {
    %c0_i32 = arith.constant 0 : i32
    %c0_i32_0 = arith.constant 0 : i32
    return %arg0, %c0_i32 : i32, i32
  }
}

</mosaic_0001>

<bundles_post_ra>
// kernel: tpu_custom_call.1
= control target key start
LH: loop header
LB: loop body
LE: loop exit
PB: predicated region body
PF: predicated region fallthrough
CT: control target
= control target key end

     0   :  { %v180_v1 = vmov 0   ;;  %s223_s0 = inlined_call_operand.vmem [shape: f32[16,1], index: 0, kind: input, shape index: {}]   ;;  %s224_s1 = inlined_call_operand.vmem [shape: f32[1,16], index: 1, kind: input, shape index: {}]   ;;  %s225_s2 = inlined_call_operand.hbm [shape: f32[16,32], index: 2, kind: output, shape index: {}]  }
   0x1   :  { %v12_v0 = vld [vmem:[%s223_s0] sm:$0xff]  ;;  %155 = vset.pattern.permute.xlu0 %v180_v1 }
   0x2   :  { %7 = vsyncpa [#allocation3], 0  ;;  %17 = vperm.xlu0 %155, %v12_v0   ;;  %v13_v2 = vld [vmem:[%s223_s0 + $0x8] sm:$0xff]  ;;  %v145_v3 = vld [vmem:[%s224_s1] ss:$0 sm:$0xff]  ;;  %vm115_vm1 = vcmask 130048  }
   0x3   :  { %s181_s0 = smov 16   ;;  %vm126_vm7 = vcmask 261248   ;;  %s182_s1 = smov [#allocation2]  }
   0x4   :  { %s134_s15 = sshll.u32 %s182_s1, 4  ;;  %s135_s15 = int_to_ptr.vmem [resolvable:$true] %s134_s15 }
   0x5   :  { %s156_s16 = scalar_lea.vmem %s135_s15, 256  ;;  %p161_p1 = scmp.lt.s32.totalorder %s135_s15, %s135_s15 }
   0x6   :  { %22 = vperm.xlu0 %155, %v13_v2   ;;  %p157_p0 = scmp.ne.s32.totalorder %s135_s15, %s156_s16  ;;  %p162_p2 = scmp.lt.s32.totalorder %s156_s16, %s156_s16 }
   0x8   :  { %p163_p3 = por %p162_p2, %p161_p1 }
   0xa   :  { %p164_p4 = pnand %p163_p3, %p157_p0 }
  0x81   :  { %v18_v4 = vpop.permute.xlu0 %17 }
  0x82   :  { %v31_v5 = vmul.f32 %v145_v3, %v18_v4 }
  0x84   :  { %v33_v6 = vmul.f32 0.63661975, %v31_v5 }
  0x85   :  { %v23_v7 = vpop.permute.xlu0 %22 }
  0x86   :  { %v35_v8 = vadd.f32 0.5, %v33_v6  ;;  %v32_v9 = vmul.f32 %v145_v3, %v23_v7 }
  0x88   :  { %v37_v10 = vfloor.f32 %v35_v8  ;;  %v34_v11 = vmul.f32 0.63661975, %v32_v9 }
  0x8a   :  { %v39_v12 = vmul.f32 1.5703125, %v37_v10  ;;  %v36_v13 = vadd.f32 0.5, %v34_v11  ;;  %v43_v15 = vmul.f32 0.0004837513, %v37_v10  ;;  %v47_v18 = vmul.f32 7.54979e-08, %v37_v10 }
  0x8b   :  { %v146_v20 = vtrunc.f32 %v37_v10 }
  0x8c   :  { %v41_v14 = vsub.f32 %v31_v5, %v39_v12  ;;  %v38_v16 = vfloor.f32 %v36_v13 }
  0x8d   :  { %v147_v27 = vcvt.f32.s32 %v146_v20 }
  0x8e   :  { %v45_v17 = vsub.f32 %v41_v14, %v43_v15  ;;  %v40_v19 = vmul.f32 1.5703125, %v38_v16  ;;  %v44_v23 = vmul.f32 0.0004837513, %v38_v16  ;;  %v48_v26 = vmul.f32 7.54979e-08, %v38_v16 }
  0x8f   :  { %v148_v31 = vtrunc.f32 %v38_v16  ;;  %v53_v35 = vand.u32 3, %v147_v27 }
  0x90   :  { %v49_v21 = vsub.f32 %v45_v17, %v47_v18  ;;  %v42_v22 = vsub.f32 %v32_v9, %v40_v19 }
  0x91   :  { %v149_v40 = vcvt.f32.s32 %v148_v31  ;;  %v105_v45 = vadd.s32 1, %v53_v35  ;;  %v89_v51 = vand.u32 1, %v53_v35  ;;  %v97_v59 = vand.u32 2, %v53_v35 }
  0x92   :  { %v55_v24 = vmul.f32 %v49_v21, %v49_v21  ;;  %v46_v25 = vsub.f32 %v42_v22, %v44_v23 }
  0x93   :  { %v54_v52 = vand.u32 3, %v149_v40  ;;  %v107_v62 = vand.u32 2, %v105_v45  ;;  %vm91_vm0 = vcmp.eq.s32.totalorder %v89_v51, 1  ;;  %vm99_vm3 = vcmp.eq.s32.totalorder %v97_v59, 2 }
  0x94   :  { %v50_v28 = vsub.f32 %v46_v25, %v48_v26  ;;  %v57_v29 = vmul.f32 -0.00019515296, %v55_v24  ;;  %v71_v30 = vmul.f32 2.4433157e-05, %v55_v24  ;;  %v79_v43 = vmul.f32 %v55_v24, %v55_v24 }
  0x95   :  { %v83_v49 = vmul.f32 0.5, %v55_v24  ;;  %v106_v2 = vadd.s32 1, %v54_v52  ;;  %v90_v5 = vand.u32 1, %v54_v52  ;;  %vm109_vm2 = vcmp.eq.s32.totalorder %v107_v62, 2 }
  0x96   :  { %v56_v32 = vmul.f32 %v50_v28, %v50_v28  ;;  %v59_v33 = vadd.f32 0.008332161, %v57_v29  ;;  %v73_v34 = vadd.f32 -0.0013887316, %v71_v30  ;;  %v98_v11 = vand.u32 2, %v54_v52 }
  0x97   :  { %v108_v14 = vand.u32 2, %v106_v2  ;;  %vm92_vm4 = vcmp.eq.s32.totalorder %v90_v5, 1 }
  0x98   :  { %v61_v36 = vmul.f32 %v59_v33, %v55_v24  ;;  %v75_v37 = vmul.f32 %v73_v34, %v55_v24  ;;  %v58_v38 = vmul.f32 -0.00019515296, %v56_v32  ;;  %v72_v39 = vmul.f32 2.4433157e-05, %v56_v32 }
  0x99   :  { %v80_v58 = vmul.f32 %v56_v32, %v56_v32  ;;  %v84_v1 = vmul.f32 0.5, %v56_v32  ;;  %vm110_vm5 = vcmp.eq.s32.totalorder %v108_v14, 2  ;;  %vm100_vm6 = vcmp.eq.s32.totalorder %v98_v11, 2 }
  0x9a   :  { %v63_v41 = vadd.f32 -0.16666655, %v61_v36  ;;  %v77_v42 = vadd.f32 0.041666646, %v75_v37  ;;  %v60_v44 = vadd.f32 0.008332161, %v58_v38 }
  0x9b   :  { %v74_v46 = vadd.f32 -0.0013887316, %v72_v39 }
  0x9c   :  { %v65_v47 = vmul.f32 %v63_v41, %v55_v24  ;;  %v81_v48 = vmul.f32 %v79_v43, %v77_v42  ;;  %v62_v50 = vmul.f32 %v60_v44, %v56_v32 }
  0x9d   :  { %v76_v53 = vmul.f32 %v74_v46, %v56_v32 }
  0x9e   :  { %v67_v54 = vmul.f32 %v65_v47, %v49_v21  ;;  %v85_v55 = vsub.f32 %v81_v48, %v83_v49  ;;  %v64_v56 = vadd.f32 -0.16666655, %v62_v50 }
  0x9f   :  { %v78_v57 = vadd.f32 0.041666646, %v76_v53 }
  0xa0   :  { %v69_v60 = vadd.f32 %v67_v54, %v49_v21  ;;  %v87_v61 = vadd.f32 1.0, %v85_v55  ;;  %v66_v63 = vmul.f32 %v64_v56, %v56_v32 }
  0xa1   :  { %v82_v0 = vmul.f32 %v80_v58, %v78_v57 }
  0xa2   :  { %v95_v3 = vsel %vm91_vm0, %v69_v60, %v87_v61  ;;  %v68_v4 = vmul.f32 %v66_v63, %v50_v28  ;;  %v93_v6 = vsel %vm91_vm0, %v87_v61, %v69_v60 }
  0xa3   :  { %v111_v7 = vsub.f32 0.0, %v95_v3  ;;  %v86_v8 = vsub.f32 %v82_v0, %v84_v1  ;;  %v101_v9 = vsub.f32 0.0, %v93_v6 }
  0xa4   :  { %v70_v10 = vadd.f32 %v68_v4, %v50_v28 }
  0xa5   :  { %v113_v12 = vsel %vm109_vm2, %v111_v7, %v95_v3  ;;  %v88_v13 = vadd.f32 1.0, %v86_v8  ;;  %v103_v15 = vsel %vm99_vm3, %v101_v9, %v93_v6 }
  0xa6   :  { %120 = vrot.lane.b32.xlu1 %v113_v12, %s181_s0  ;;  %116 = vst.msk [vmem:[#allocation2] sm:$0xff] %vm115_vm1, %v103_v15 }
  0xa7   :  { %v96_v16 = vsel %vm92_vm4, %v70_v10, %v88_v13  ;;  %v94_v17 = vsel %vm92_vm4, %v88_v13, %v70_v10 }
  0xa8   :  { %v112_v18 = vsub.f32 0.0, %v96_v16  ;;  %v102_v19 = vsub.f32 0.0, %v94_v17 }
  0xaa   :  { %v114_v20 = vsel %vm110_vm5, %v112_v18, %v96_v16  ;;  %v104_v21 = vsel %vm100_vm6, %v102_v19, %v94_v17 }
  0xab   :  { %122 = vrot.lane.b32.xlu1 %v114_v20, %s181_s0  ;;  %117 = vst.msk [vmem:[#allocation2 + $0x8] sm:$0xff] %vm115_vm1, %v104_v21 }
 0x118   :  { %v121_v22 = vpop.permute.xlu1 %120 }
 0x119   :  { %127 = vst.msk [vmem:[#allocation2] sm:$0xff] %vm126_vm7, %v121_v22 }
 0x11d   :  { %v123_v23 = vpop.permute.xlu1 %122 }
 0x11e   :  { %128 = vst.msk [vmem:[#allocation2 + $0x8] sm:$0xff] %vm126_vm7, %v123_v23 }
 0x11f   :  { %167 = shalt.err (!%p164_p4)
}
 0x120   :  { %s168_s19 = scalar_lea.hbm %s225_s2, 256 }
 0x121   :  { %p169_p5 = scmp.ne.s32.totalorder %s225_s2, %s168_s19  ;;  %p172_p6 = scmp.lt.u32.totalorder %s168_s19, %s225_s2 }
 0x123   :  { %p174_p7 = pnand %p172_p6, %p169_p5 }
 0x125   :  { %177 = shalt.err (!%p174_p7)
}
 0x126   :  { %s183_s24 = smov 128   ;;  %s184_s25 = smov 8  }
 0x127   :  { %140 = dma.vmem_to_hbm [thread:$0]  %s135_s15, 256, %s225_s2, [#allocation3], %s183_s24, %s183_s24, %s184_s25  }
 0x128   :  { %178 = dma.done.wait [#allocation3], 256  }
 0x129   :  { %179 = vsyncadd [#allocation3], 4294967040 }
 0x12a   :  { %144 = vsyncpa [#allocation3], 1 }

</bundles_post_ra>
